<compile_context>
chip_gen: v5e
topology: v5e:2x2
jax: 0.10.0
libtpu: 0.0.40
codegen_flags: <defaults>
</compile_context>

<pallas_src>
import functools

import jax
import jax.numpy as jnp
from jax.experimental import pallas as pl
from jax.experimental.pallas import tpu as pltpu


def _static_projector_kernel(tok_ref, feat_ref, wkva_ref, wq_ref, bq_ref,
                             out_ref, *, C):
    tok = tok_ref[0]                       # (CT+1, L)  bf16, last row = ones
    feat = feat_ref[0]                     # (C, tHW)   f32

    # Fused k/v projection; biases folded via the ones row: (2C, L) f32 acc.
    kv = jnp.dot(wkva_ref[...], tok, preferred_element_type=jnp.float32)
    k = kv[:C].astype(jnp.bfloat16)        # (C, L)
    v = kv[C:].astype(jnp.bfloat16)        # (C, L)

    # q projection: (C, tHW) f32, bias added in f32, then bf16 for the MXU.
    q = jnp.dot(wq_ref[...], feat.astype(jnp.bfloat16),
                preferred_element_type=jnp.float32) + bq_ref[...]
    q = q.astype(jnp.bfloat16)

    # scores (L, tHW): contract the channel dim of k and q -> HW lane-dense,
    # no transpose of q or of the attention matrix is ever needed.
    s = jax.lax.dot_general(k, q, (((0,), (0,)), ((), ())),
                            preferred_element_type=jnp.float32)

    # Softmax over the token axis (axis 0, size L); all elementwise math f32.
    s = s - jnp.max(s, axis=0, keepdims=True)
    e = jnp.exp(s)
    attn = e * pl.reciprocal(jnp.sum(e, axis=0, keepdims=True), approx=True)

    # kqv = v @ attn -> (C, tHW); residual add in f32.
    kqv = jnp.dot(v, attn.astype(jnp.bfloat16),
                  preferred_element_type=jnp.float32)
    out_ref[0] = feat + kqv


def _pick_hw_tile(hw, max_tile):
    """Largest lane-friendly HW tile <= max_tile that divides HW."""
    if hw <= max_tile:
        return hw
    if hw % 128 == 0:
        t = (max_tile // 128) * 128
        while t >= 128:
            if hw % t == 0:
                return t
            t -= 128
    return hw  # fallback: single full-HW tile


def static_projector(tokens, feature, params, *, max_hw_tile=4096):
    """tokens: (B, CT, L) f32; feature: (B, C, H, W) f32."""
    B, C, H, W = feature.shape
    _, CT, L = tokens.shape
    HW = H * W

    # Pack Wk/Wv into one weight and fold bk/bv via an appended ones-row on
    # the tokens (1x1 convs == plain matmuls). Weights go to bf16 for the MXU.
    wkv = jnp.concatenate([params["wk"], params["wv"]], axis=0)          # (2C, CT)
    bkv = jnp.concatenate([params["bk"], params["bv"]], axis=0)          # (2C, 1)
    wkva = jnp.concatenate([wkv, bkv], axis=1).astype(jnp.bfloat16)      # (2C, CT+1)
    wq = params["wq"].astype(jnp.bfloat16)                               # (C, C)
    bq = params["bq"].astype(jnp.float32)                                # (C, 1)

    tok_aug = jnp.concatenate(
        [tokens, jnp.ones((B, 1, L), tokens.dtype)], axis=1
    ).astype(jnp.bfloat16)                                               # (B, CT+1, L)

    feat_flat = feature.reshape(B, C, HW).astype(jnp.float32)

    thw = _pick_hw_tile(HW, max_hw_tile)
    nhw = HW // thw

    kernel = functools.partial(_static_projector_kernel, C=C)

    out_flat = pl.pallas_call(
        kernel,
        out_shape=jax.ShapeDtypeStruct((B, C, HW), jnp.float32),
        grid=(B, nhw),
        in_specs=[
            pl.BlockSpec((1, CT + 1, L), lambda b, t: (b, 0, 0)),   # tokens (+ones)
            pl.BlockSpec((1, C, thw), lambda b, t: (b, 0, t)),      # feature tile
            pl.BlockSpec((2 * C, CT + 1), lambda b, t: (0, 0)),     # [Wk;Wv | bk;bv]
            pl.BlockSpec((C, C), lambda b, t: (0, 0)),              # Wq
            pl.BlockSpec((C, 1), lambda b, t: (0, 0)),              # bq
        ],
        out_specs=pl.BlockSpec((1, C, thw), lambda b, t: (b, 0, t)),
        input_output_aliases={1: 0},      # out = feature + kqv, reuse feat buffer
        compiler_params=pltpu.CompilerParams(
            dimension_semantics=("parallel", "parallel")),
    )(tok_aug, feat_flat, wkva, wq, bq)

    return out_flat.reshape(B, C, H, W)


def _reference(tokens, feature, params):
    """Plain-JAX f32 reference mirroring the PyTorch forward."""
    B, C, H, W = feature.shape
    k = jnp.einsum("oc,bcl->bol", params["wk"], tokens) + params["bk"][None]
    q = jnp.einsum("oc,bcx->box", params["wq"],
                   feature.reshape(B, C, H * W)) + params["bq"][None]
    q = jnp.transpose(q, (0, 2, 1))                     # (B, HW, C)
    kq = jnp.einsum("bxc,bcl->bxl", q, k)
    kq = jax.nn.softmax(kq, axis=2)
    v = jnp.einsum("oc,bcl->bol", params["wv"], tokens) + params["bv"][None]
    kqv = jnp.einsum("bcl,bxl->bcx", v, kq).reshape(B, C, H, W)
    return feature + kqv


if __name__ == "__main__":
    B, C, CT, H, W, L = 2, 32, 16, 16, 16, 8

    key = jax.random.PRNGKey(0)
    k_tok, k_feat, k1, k2, k3, k4, k5, k6 = jax.random.split(key, 8)

    tokens = jax.random.normal(k_tok, (B, CT, L), dtype=jnp.float32)
    feature = jax.random.normal(k_feat, (B, C, H, W), dtype=jnp.float32)

    params = {
        "wk": 0.1 * jax.random.normal(k1, (C, CT), dtype=jnp.float32),
        "bk": 0.1 * jax.random.normal(k2, (C, 1), dtype=jnp.float32),
        "wq": 0.1 * jax.random.normal(k3, (C, C), dtype=jnp.float32),
        "bq": 0.1 * jax.random.normal(k4, (C, 1), dtype=jnp.float32),
        "wv": 0.1 * jax.random.normal(k5, (C, CT), dtype=jnp.float32),
        "bv": 0.1 * jax.random.normal(k6, (C, 1), dtype=jnp.float32),
    }

    ref = _reference(tokens, feature, params)

    out = static_projector(tokens, feature, params)
    out = jax.block_until_ready(out)

    assert out.shape == (B, C, H, W)
    # bf16 MXU operands (f32 accumulation) justify a relaxed tolerance vs the
    # pure-f32 reference (per review: bf16 inputs typically need ~1e-2 rtol).
    max_err = float(jnp.max(jnp.abs(out - ref)))
    assert jnp.allclose(out, ref, atol=5e-2, rtol=2e-2), \
        f"max abs err = {max_err}"

    print("KERNEL_OK")
</pallas_src>

<mosaic_0001>
module attributes {stable_mosaic.version = 11 : i64} {
  func.func @_static_projector_kernel(%arg0: i32, %arg1: i32, %arg2: memref<1x17x8xbf16, #tpu.memory_space<vmem>>, %arg3: memref<1x32x256xf32, #tpu.memory_space<vmem>>, %arg4: memref<64x17xbf16, #tpu.memory_space<vmem>>, %arg5: memref<32x32xbf16, #tpu.memory_space<vmem>>, %arg6: memref<32x1xf32, #tpu.memory_space<vmem>>, %arg7: memref<1x32x256xf32, #tpu.memory_space<vmem>>) attributes {dimension_semantics = [#tpu.dimension_semantics<parallel>, #tpu.dimension_semantics<parallel>], iteration_bounds = array<i64: 2, 1>, scalar_prefetch = 0 : i64, scratch_operands = 0 : i64, tpu.core_type = #tpu.core_type<tc>, window_params = [{transform_indices = @transform_0, window_bounds = array<i64: 1, 17, 8>}, {transform_indices = @transform_1, window_bounds = array<i64: 1, 32, 256>}, {pipeline_mode = #tpu.pipeline_mode<synchronous>, transform_indices = @transform_2, window_bounds = array<i64: 64, 17>}, {pipeline_mode = #tpu.pipeline_mode<synchronous>, transform_indices = @transform_3, window_bounds = array<i64: 32, 32>}, {pipeline_mode = #tpu.pipeline_mode<synchronous>, transform_indices = @transform_4, window_bounds = array<i64: 32, 1>}, {transform_indices = @transform_5, window_bounds = array<i64: 1, 32, 256>}]} {
    %c0 = arith.constant 0 : index
    %c0_0 = arith.constant 0 : index
    %c0_1 = arith.constant 0 : index
    %0 = vector.load %arg2[%c0, %c0_0, %c0_1] : memref<1x17x8xbf16, #tpu.memory_space<vmem>>, vector<1x17x8xbf16>
    %1 = vector.shape_cast %0 : vector<1x17x8xbf16> to vector<17x8xbf16>
    %c0_2 = arith.constant 0 : index
    %c0_3 = arith.constant 0 : index
    %c0_4 = arith.constant 0 : index
    %2 = vector.load %arg3[%c0_2, %c0_3, %c0_4] : memref<1x32x256xf32, #tpu.memory_space<vmem>>, vector<1x32x256xf32>
    %3 = vector.shape_cast %2 : vector<1x32x256xf32> to vector<32x256xf32>
    %c0_5 = arith.constant 0 : index
    %c0_6 = arith.constant 0 : index
    %4 = vector.load %arg4[%c0_5, %c0_6] : memref<64x17xbf16, #tpu.memory_space<vmem>>, vector<64x17xbf16>
    %cst = arith.constant dense<0.000000e+00> : vector<64x8xf32>
    %5 = tpu.matmul %4, %1, %cst {dimension_numbers = #tpu.dot_dimension_numbers<[1], [0], [0], [1], [0, 0, 1, 1], [], []>} : vector<64x17xbf16>, vector<17x8xbf16>, vector<64x8xf32> -> vector<64x8xf32>
    %6 = vector.extract_strided_slice %5 {offsets = [0, 0], sizes = [32, 8], strides = [1, 1]} : vector<64x8xf32> to vector<32x8xf32>
    %7 = arith.truncf %6 : vector<32x8xf32> to vector<32x8xbf16>
    %8 = vector.extract_strided_slice %5 {offsets = [32, 0], sizes = [32, 8], strides = [1, 1]} : vector<64x8xf32> to vector<32x8xf32>
    %9 = arith.truncf %8 : vector<32x8xf32> to vector<32x8xbf16>
    %c0_7 = arith.constant 0 : index
    %c0_8 = arith.constant 0 : index
    %10 = vector.load %arg5[%c0_7, %c0_8] : memref<32x32xbf16, #tpu.memory_space<vmem>>, vector<32x32xbf16>
    %11 = arith.truncf %3 : vector<32x256xf32> to vector<32x256xbf16>
    %cst_9 = arith.constant dense<0.000000e+00> : vector<32x256xf32>
    %12 = tpu.matmul %10, %11, %cst_9 {dimension_numbers = #tpu.dot_dimension_numbers<[1], [0], [0], [1], [0, 0, 1, 1], [], []>} : vector<32x32xbf16>, vector<32x256xbf16>, vector<32x256xf32> -> vector<32x256xf32>
    %c0_10 = arith.constant 0 : index
    %c0_11 = arith.constant 0 : index
    %13 = vector.load %arg6[%c0_10, %c0_11] : memref<32x1xf32, #tpu.memory_space<vmem>>, vector<32x1xf32>
    %14 = vector.broadcast %13 : vector<32x1xf32> to vector<32x256xf32>
    %15 = arith.addf %12, %14 : vector<32x256xf32>
    %16 = arith.truncf %15 : vector<32x256xf32> to vector<32x256xbf16>
    %cst_12 = arith.constant dense<0.000000e+00> : vector<8x256xf32>
    %17 = tpu.matmul %7, %16, %cst_12 {dimension_numbers = #tpu.dot_dimension_numbers<[0], [0], [1], [1], [0, 1, 1, 1], [], []>} : vector<32x8xbf16>, vector<32x256xbf16>, vector<8x256xf32> -> vector<8x256xf32>
    %cst_13 = arith.constant dense<0xFF800000> : vector<256xf32>
    %18 = vector.multi_reduction <maximumf>, %17, %cst_13 [0] : vector<8x256xf32> to vector<256xf32>
    %19 = vector.shape_cast %18 : vector<256xf32> to vector<1x256xf32>
    %20 = vector.broadcast %19 : vector<1x256xf32> to vector<8x256xf32>
    %21 = arith.subf %17, %20 : vector<8x256xf32>
    %22 = math.exp %21 : vector<8x256xf32>
    %cst_14 = arith.constant dense<0.000000e+00> : vector<256xf32>
    %23 = vector.multi_reduction <add>, %22, %cst_14 [0] : vector<8x256xf32> to vector<256xf32>
    %24 = vector.shape_cast %23 : vector<256xf32> to vector<1x256xf32>
    %25 = tpu.reciprocal %24 {approx = true} : vector<1x256xf32> -> vector<1x256xf32>
    %26 = vector.broadcast %25 : vector<1x256xf32> to vector<8x256xf32>
    %27 = arith.mulf %22, %26 : vector<8x256xf32>
    %28 = arith.truncf %27 : vector<8x256xf32> to vector<8x256xbf16>
    %cst_15 = arith.constant dense<0.000000e+00> : vector<32x256xf32>
    %29 = tpu.matmul %9, %28, %cst_15 {dimension_numbers = #tpu.dot_dimension_numbers<[1], [0], [0], [1], [0, 0, 1, 1], [], []>} : vector<32x8xbf16>, vector<8x256xbf16>, vector<32x256xf32> -> vector<32x256xf32>
    %30 = arith.addf %3, %29 : vector<32x256xf32>
    %c0_16 = arith.constant 0 : index
    %c0_17 = arith.constant 0 : index
    %c0_18 = arith.constant 0 : index
    %31 = vector.load %arg7[%c0_16, %c0_17, %c0_18] : memref<1x32x256xf32, #tpu.memory_space<vmem>>, vector<1x32x256xf32>
    %32 = vector.shape_cast %31 : vector<1x32x256xf32> to vector<32x256xf32>
    %33 = vector.shape_cast %30 : vector<32x256xf32> to vector<1x32x256xf32>
    tpu.vector_store %arg7[%c0_16, %c0_17, %c0_18], %33 {strides = array<i32>} : memref<1x32x256xf32, #tpu.memory_space<vmem>>, vector<1x32x256xf32>,
    return
  }
  func.func @transform_0(%arg0: i32, %arg1: i32) -> (i32, i32, i32) {
    %c0_i32 = arith.constant 0 : i32
    %c0_i32_0 = arith.constant 0 : i32
    %c0_i32_1 = arith.constant 0 : i32
    return %arg0, %c0_i32, %c0_i32_0 : i32, i32, i32
  }
  func.func @transform_1(%arg0: i32, %arg1: i32) -> (i32, i32, i32) {
    %c0_i32 = arith.constant 0 : i32
    %c0_i32_0 = arith.constant 0 : i32
    return %arg0, %c0_i32, %arg1 : i32, i32, i32
  }
  func.func @transform_2(%arg0: i32, %arg1: i32) -> (i32, i32) {
    %c0_i32 = arith.constant 0 : i32
    %c0_i32_0 = arith.constant 0 : i32
    %c0_i32_1 = arith.constant 0 : i32
    return %c0_i32, %c0_i32_0 : i32, i32
  }
  func.func @transform_3(%arg0: i32, %arg1: i32) -> (i32, i32) {
    %c0_i32 = arith.constant 0 : i32
    %c0_i32_0 = arith.constant 0 : i32
    %c0_i32_1 = arith.constant 0 : i32
    return %c0_i32, %c0_i32_0 : i32, i32
  }
  func.func @transform_4(%arg0: i32, %arg1: i32) -> (i32, i32) {
    %c0_i32 = arith.constant 0 : i32
    %c0_i32_0 = arith.constant 0 : i32
    %c0_i32_1 = arith.constant 0 : i32
    return %c0_i32, %c0_i32_0 : i32, i32
  }
  func.func @transform_5(%arg0: i32, %arg1: i32) -> (i32, i32, i32) {
    %c0_i32 = arith.constant 0 : i32
    %c0_i32_0 = arith.constant 0 : i32
    return %arg0, %c0_i32, %arg1 : i32, i32, i32
  }
}

</mosaic_0001>

<bundles_post_ra>
// kernel: tpu_custom_call.1
= control target key start
LH: loop header
LB: loop body
LE: loop exit
PB: predicated region body
PF: predicated region fallthrough
CT: control target
= control target key end

     0   :  { %10 = vsyncpa [#allocation3], 0  ;;  %s1240_s0 = inlined_call_operand.vmem [shape: bf16[2,17,8], index: 0, kind: input, shape index: {}]   ;;  %s1241_s1 = inlined_call_operand.hbm [shape: f32[2,32,256], index: 1, kind: input, shape index: {}, may-alias: {1,5}]   ;;  %s1242_s2 = inlined_call_operand.vmem [shape: bf16[64,17], index: 2, kind: input, shape index: {}]   ;;  %s1243_s3 = inlined_call_operand.vmem [shape: bf16[32,32], index: 3, kind: input, shape index: {}]   ;;  %s1244_s4 = inlined_call_operand.vmem [shape: f32[32,1], index: 4, kind: input, shape index: {}]   ;;  %s1245_s5 = inlined_call_operand.hbm [shape: f32[2,32,256], index: 5, kind: output, shape index: {}, may-alias: {1,5}]  }
   0x1   :  { %12 = vsyncpa [#allocation3 + $0x1], 0 }
   0x2   :  { %13 = vsyncpa [#allocation4], 0 }
   0x3   :  { %15 = vsyncpa [#allocation4 + $0x1], 0  ;;  %s1037_s18 = smov 0   ;;  %s1039_s19 = smov 0  }
   0x4   :  { %s1041_s20 = smov 0   ;;  %s1043_s21 = smov 0  }
   0x5   :  { %s1045_s22 = smov 0   ;;  %s1047_s23 = smov 0  }
   0x6 LB: > { %s743_s24 = sadd.s32 4294967295, %s1000_s23   ;;  %s744_s25 = sadd.s32 4294967294, %s1000_s23   ;;  %s1000_s23 = sphi %s1047_s23, %s21_s23   ;;  %s996_s22 = sphi %s1045_s22, %s1254_s22   ;;  %s992_s21 = sphi %s1043_s21, %s1253_s21   ;;  %s988_s20 = sphi %s1041_s20, %s1252_s20   ;;  %s984_s19 = sphi %s1039_s19, %s1251_s19   ;;  %s980_s18 = sphi %s1037_s18, %s1250_s18  }
   0x7   : > { %s33_s26 = sadd.s32 1, %s996_s22  ;;  %s68_s27 = sadd.s32 1, %s988_s20 }
   0x8   : > { %p35_p0 = scmp.ge.s32.totalorder %s33_s26, 2  ;;  %p75_p1 = scmp.ne.s32.totalorder %s988_s20, %s984_s19 }
   0x9   : > { %p76_p2 = scmp.eq.s32.totalorder %s1000_s23, 0  ;;  %p81_p3 = scmp.ne.s32.totalorder %s984_s19, %s980_s18 }
   0xa   : > { %s1256_s26 = smov (%p35_p0, %s33_s26), 0  ;;  %p82_p5 = scmp.eq.s32.totalorder %s743_s24, 0 }
   0xb   : > { %p1078_p4 = por %p76_p2, %p75_p1  ;;  %s63_s29 = ssub.s32 %s996_s22, %s1256_s26 }
   0xc   : > { %p170_p6 = scmp.eq.s32.totalorder %s743_s24, 1  ;;  %p66_p7 = scmp.eq.s32.totalorder %s63_s29, 0 }
   0xd   : > { %p1084_p8 = por %p82_p5, %p81_p3  ;;  %p176_p10 = scmp.eq.s32.totalorder %s744_s25, 1 }
   0xe   : > { %p1088_p9 = por %p170_p6, %p75_p1  ;;  %p746_p12 = scmp.ge.s32.totalorder %s1000_s23, 2 }
   0xf   : > { %s1093_s7 = scalar_select %p66_p7, %s988_s20, %s68_s27  }
  0x10   : > { %p1095_p11 = por %p176_p10, %p81_p3  ;;  %p823_p13 = scmp.lt.s32.totalorder %s1000_s23, 2 }
  0x11   : > { %s213_s9 = sand.u32 1, %s988_s20   ;;  %s801_s11 = sshll.u32 %s996_s22, 6 }
  0x12   : > { %s747_s10 = sshll.u32 %s213_s9, 6  ;;  %s224_s14 = scalar_lea.hbm %s1241_s1, %s801_s11 }
  0x13   : > { %s217_s15 = scalar_lea.vmem [#allocation2], %s747_s10  ;;  %s225_s17 = sshll.u32 %s224_s14, 4  ;;  %s226_s17 = int_to_ptr.hbm [resolvable:$true] %s225_s17 }
  0x14   : > { %s227_s16 = sshll.u32 %s217_s15, 4  ;;  %p816_p0 = pnand %p823_p13, %p1078_p4  ;;  %s228_s16 = int_to_ptr.vmem [resolvable:$true] %s227_s16 }
  0x15   : > { %p750_p1 = scmp.ge.s32.totalorder %s1000_s23, 1  ;;  %s214_s24 = scalar_lea.sflag [#allocation3], %s213_s9 }
  0x16   : > { %s1002_s25 = smov 256   ;;  %s1003_s27 = smov 16  }
  0x17   : > { %818 = dma.hbm_to_vmem [thread:$0]  (!%p816_p0), %s226_s17, 1024, %s228_s16, %s214_s24, %s1002_s25, %s1002_s25, %s1003_s27  }
  0x18   : > { %p235_p2 = scmp.lt.s32.totalorder %s1000_s23, 3 }
  0x1a   : > { %p236_p3 = pnand %p750_p1, %p235_p2 }
  0x1b   : > { %s1111_s29 = sand.u32 (!%p236_p3), 1, %s984_s19  }
  0x1c   : > { %239 = sbr.rel (%p236_p3) target bundleno = 713 (0x2c9), region = 40  ;;  %s751_s10 = sshll.u32 (!%p236_p3), %s1111_s29, 6 }
  0x1d   : > { %s242_s11 = scalar_lea.sflag (!%p236_p3), [#allocation3], %s1111_s29  ;;  %s245_s28 = scalar_lea.vmem (!%p236_p3), [#allocation2], %s751_s10 }
  0x21   : > { %971 = dma.done.wait (%p1084_p8), %s242_s11, 1024  }
  0x22   : > { %973 = vsyncadd (%p1084_p8), %s242_s11, 4294966272  ;;  %p278_p4 = scmp.lt.s32.totalorder %s992_s21, 1  ;;  %v1004_v0 = vmov 0   ;;  %vm347_vm0 = vcmask 1040384   ;;  %v1126_v3 = vld [vmem:[%s245_s28 + $0x20] sm:$0xff]  ;;  %v1128_v4 = vld [vmem:[%s245_s28 + $0x30] sm:$0xff] }
  0x23   : > { %878 = vset.pattern.permute.xlu0 %v1004_v0  ;;  %879 = vset.pattern.permute.xlu1 %v1004_v0  ;;  %v349_v5 = vsel %vm347_vm0, 65535, %v1004_v0  ;;  %v392_v6 = vpack.c.bf16 %v1128_v4, %v1126_v3  ;;  %v1132_v7 = vld [vmem:[%s245_s28] sm:$0xff]  ;;  %v1134_v8 = vld [vmem:[%s245_s28 + $0x10] sm:$0xff]  ;;  %v1136_v10 = vld [vmem:[%s245_s28 + $0x28] sm:$0xff]  ;;  %vm428_vm1 = vcmask 261120   ;;  %vm334_vm2 = vcmask 138240  }
  0x24   : > { %s279_s9 = scalar_select %p278_p4, %s992_s21, 1  ;;  %v1138_v11 = vld [vmem:[%s245_s28 + $0x38] sm:$0xff]  ;;  %v1140_v12 = vld [vmem:[%s245_s28 + $0x8] sm:$0xff]  ;;  %v390_v13 = vpack.c.bf16 %v1134_v8, %v1132_v7  ;;  %v807_v19 = vld [vmem:[%s1243_s3] sm:$0xff]  ;;  %vm565_vm3 = vcmask 1043456   ;;  %vm558_vm4 = vcmask 64512  }
  0x25   : > { %441 = vmatpush.bf16.msra.mxu1 %v392_v6  ;;  %v393_v14 = vpack.c.bf16 %v1138_v11, %v1136_v10  ;;  %v1146_v15 = vld [vmem:[%s245_s28 + $0x18] sm:$0xff]  ;;  %v803_v20 = vld [vmem:[%s1242_s2] sm:$0xff]  ;;  %v804_v21 = vld [vmem:[%s1242_s2 + $0x8] sm:$0xff]  ;;  %s277_s28 = scalar_lea.vmem [#allocation5], %s751_s10  ;;  %s809_s10 = sshll.u32 %s992_s21, 6 }
  0x26   : > { %s810_s12 = smul.u32 12, %s279_s9  ;;  %v391_v17 = vpack.c.bf16 %v1146_v15, %v1140_v12  ;;  %v808_v22 = vld [vmem:[%s1243_s3 + $0x8] sm:$0xff]  ;;  %v396_v23 = vld [vmem:[%s1244_s4 + $0x10] sm:$0xff]  ;;  %v394_v24 = vld [vmem:[%s1244_s4] sm:$0xff]  ;;  %s640_s13 = scalar_lea.hbm %s1245_s5, %s809_s10 }
  0x27   : > { %460 = vmatpush.bf16.msra.mxu2 %v393_v14  ;;  %410 = vperm.xlu0 %878, %v396_v23   ;;  %v397_v25 = vld [vmem:[%s1244_s4 + $0x18] sm:$0xff]  ;;  %v395_v26 = vld [vmem:[%s1244_s4 + $0x8] sm:$0xff]  ;;  %v805_v57 = vld [vmem:[%s1242_s2 + $0x10] sm:$0xff]  ;;  %s641_s14 = sshll.u32 %s277_s28, 4  ;;  %s627_s30 = scalar_lea.sflag [#allocation4], %s1111_s29  ;;  %s642_s14 = int_to_ptr.vmem [resolvable:$true] %s641_s14 }
  0x28   : > { %s282_s15 = scalar_lea.vmem %s1240_s0, %s810_s12  ;;  %400 = vperm.xlu1 %879, %v394_v24   ;;  %v806_v58 = vld [vmem:[%s1242_s2 + $0x18] sm:$0xff]  ;;  %s938_s25 = scalar_lea.hbm %s1245_s5, 128 }
  0x29   : > { %v288_v1 = vld [vmem:[%s282_s15 + $0x8] sm:$0x1]  ;;  %v802_v18 = vld [vmem:[%s282_s15] sm:$0xff]  ;;  %442 = vmatpush.bf16.msra.mxu1 %v390_v13  ;;  %s643_s15 = sshll.u32 %s640_s13, 4  ;;  %s644_s15 = int_to_ptr.hbm [resolvable:$true] %s643_s15 }
  0x2a   : > { %v330_v2 = vunpack.c.l.b16 %v288_v1  ;;  %s932_s16 = sshra.s32 %s644_s15, 4  ;;  %s933_s16 = int_to_ptr.hbm [resolvable:$true] %s932_s16 }
  0x2b   : > { %461 = vmatpush.bf16.msra.mxu2 %v391_v17  ;;  %s934_s21 = scalar_lea.hbm %s933_s16, 64  ;;  %p939_p8 = scmp.lt.s32.totalorder %s933_s16, %s1245_s5 }
  0x2c   : > { %v332_v9 = vpack.c.b16 %v330_v2, %v330_v2  ;;  %786 = vmatmul.msk.bf16.vlgmr.msra.gmra.mxu1 %vm428_vm1, %v807_v19  ;;  %p935_p5 = scmp.ne.s32.totalorder %s933_s16, %s934_s21  ;;  %p940_p10 = scmp.lt.s32.totalorder %s938_s25, %s934_s21 }
  0x2e   : > { %v351_v16 = vand.u32 %v349_v5, %v332_v9  ;;  %788 = vmatmul.msk.bf16.vlgmr.msra.gmra.mxu2 %vm428_vm1, %v807_v19  ;;  %p936_p6 = pnand %p935_p5, %p1088_p9  ;;  %p941_p13 = por %p940_p10, %p939_p8 }
  0x2f   : > { %415 = vperm.xlu0 %878, %v397_v25  }
  0x30   : > { %359 = vmatpush.bf16.msra.mxu0 %v351_v16  ;;  %405 = vperm.xlu1 %879, %v395_v26   ;;  %p937_p7 = pneg %p936_p6 }
  0x32   : > { %p942_p0 = pnand %p941_p13, %p937_p7 }
  0x34   : > { %360 = vmatpush.bf16.msra.mxu0 %v802_v18 }
  0x37   : > { %774 = vmatmul.msk.bf16.vlgmr.msra.gmra.mxu0 %vm334_vm2, %v803_v20 }
  0x3c   : > { %787 = vmatmul.msk.bf16.gmra.mxu1 %vm428_vm1, %v808_v22 }
  0x3e   : > { %789 = vmatmul.msk.bf16.gmra.mxu2 %vm428_vm1, %v808_v22 }
  0x47   : > { %775 = vmatmul.msk.bf16.gmra.mxu0 %vm334_vm2, %v804_v21 }
  0x57   : > { %776 = vmatmul.msk.bf16.gmra.mxu0 %vm334_vm2, %v805_v57 }
  0x67   : > { %777 = vmatmul.msk.bf16.gmra.mxu0 %vm334_vm2, %v806_v58 }
  0x99   : > { %v411_v37 = vpop.permute.xlu0 %410 }
  0x9a   : > { %v401_v39 = vpop.permute.xlu1 %400 }
  0xa1   : > { %v416_v40 = vpop.permute.xlu0 %415 }
  0xa2   : > { %v406_v46 = vpop.permute.xlu1 %405 }
  0xa9   : > { %v444_v33 = vpop.f32.mrf.mxu1 }
  0xaa   : > { %v445_v44 = vadd.f32 %v444_v33, %v401_v39 }
  0xb1   : > { %v463_v34 = vpop.f32.mrf.mxu2  ;;  %v446_v35 = vpop.f32.mrf.mxu1 }
  0xb2   : > { %v447_v47 = vadd.f32 %v446_v35, %v406_v46  ;;  %v464_v52 = vadd.f32 %v463_v34, %v401_v39 }
  0xb4   : > { %v362_v27 = vpop.f32.mrf.mxu0  ;;  %v473_v50 = vpack.c.bf16 %v447_v47, %v445_v44 }
  0xb9   : > { %v465_v36 = vpop.f32.mrf.mxu2  ;;  %v449_v38 = vpop.f32.mrf.mxu1 }
  0xba   : > { %v450_v42 = vadd.f32 %v449_v38, %v411_v37  ;;  %v466_v53 = vadd.f32 %v465_v36, %v406_v46 }
  0xbc   : > { %v364_v28 = vpop.f32.mrf.mxu0  ;;  %v474_v56 = vpack.c.bf16 %v466_v53, %v464_v52 }
  0xbd   : > { %v382_v29 = vpack.c.bf16 %v364_v28, %v362_v27 }
  0xbf   : > { %477 = vxpose.xlu2.c.b16.start [1/2] (short) (narrow) %v382_v29, 16 }
  0xc1   : > { %v468_v41 = vpop.f32.mrf.mxu2  ;;  %v451_v43 = vpop.f32.mrf.mxu1 }
  0xc2   : > { %v452_v45 = vadd.f32 %v451_v43, %v416_v40  ;;  %v469_v49 = vadd.f32 %v468_v41, %v411_v37 }
  0xc4   : > { %v367_v30 = vpop.f32.mrf.mxu0  ;;  %v475_v48 = vpack.c.bf16 %v452_v45, %v450_v42 }
  0xc6   : > { %502 = vmatpush.bf16.msra.mxu3 %v475_v48 }
  0xc9   : > { %v470_v51 = vpop.f32.mrf.mxu2 }
  0xca   : > { %v471_v54 = vadd.f32 %v470_v51, %v416_v40  ;;  %503 = vmatpush.bf16.msra.mxu3 %v473_v50 }
  0xcc   : > { %v369_v31 = vpop.f32.mrf.mxu0  ;;  %v476_v55 = vpack.c.bf16 %v471_v54, %v469_v49 }
  0xcd   : > { %v383_v32 = vpack.c.bf16 %v369_v31, %v367_v30 }
  0xce   : > { %515 = vmatpush.bf16.msrb.mxu3 %v476_v55 }
  0xcf   : > { %478 = vxpose.xlu2.c.b16.end [2/2] (short) (narrow) %v383_v32, 16 }
  0xd2   : > { %516 = vmatpush.bf16.msrb.mxu3 %v474_v56 }
  0xd4   : > { %v372_v28 = vpop.f32.mrf.mxu0 }
  0xdc   : > { %v374_v34 = vpop.f32.mrf.mxu0 }
  0xdd   : > { %v384_v42 = vpack.c.bf16 %v374_v34, %v372_v28 }
  0xe4   : > { %v377_v45 = vpop.f32.mrf.mxu0 }
  0xec   : > { %v379_v48 = vpop.f32.mrf.mxu0 }
  0xed   : > { %v385_v51 = vpack.c.bf16 %v379_v48, %v377_v45 }
 0x160   : > { %v485_v59 = vpop.trf.xlu2 }
 0x161   : > { %790 = vmatmul.msk.bf16.vlgmr.msra.gmra.mxu3 %vm428_vm1, %v485_v59 }
 0x171   : > { %791 = vmatmul.msk.bf16.vlgmr.msrb.gmra.mxu3 %vm428_vm1, %v485_v59 }
 0x1e4   : > { %v505_v60 = vpop.f32.mrf.mxu3 }
 0x1e5   : > { %v522_v61 = vrot.slane %v505_v60, 4 }
 0x1e7   : > { %v523_v62 = vmax.f32 %v505_v60, %v522_v61 }
 0x1e9   : > { %v524_v63 = vrot.slane %v523_v62, 2 }
 0x1eb   : > { %v525_v0 = vmax.f32 %v523_v62, %v524_v63 }
 0x1ec   : > { %v507_v1 = vpop.f32.mrf.mxu3 }
 0x1ed   : > { %v526_v2 = vrot.slane %v525_v0, 1 }
 0x1ef   : > { %v527_v5 = vmax.f32 %v525_v0, %v526_v2 }
 0x1f1   : > { %v534_v6 = vsub.f32 %v505_v60, %v527_v5 }
 0x1f3   : > { %v536_v9 = vmul.f32 1.442695, %v534_v6 }
 0x1f4   : > { %v518_v13 = vpop.f32.mrf.mxu3 }
 0x1f5   : > { %880 = vpow2.f32 %v536_v9  ;;  %v528_v14 = vrot.slane %v518_v13, 4 }
 0x1f7   : > { %v529_v16 = vmax.f32 %v518_v13, %v528_v14 }
 0x1f9   : > { %v530_v17 = vrot.slane %v529_v16, 2 }
 0x1fb   : > { %v881_v18 = vpop.eup %880  ;;  %v531_v19 = vmax.f32 %v529_v16, %v530_v17 }
 0x1fc   : > { %v520_v20 = vpop.f32.mrf.mxu3  ;;  %v540_v21 = vrot.slane %v881_v18, 4 }
 0x1fd   : > { %v532_v22 = vrot.slane %v531_v19, 1 }
 0x1fe   : > { %v541_v23 = vadd.f32 %v881_v18, %v540_v21 }
 0x1ff   : > { %v533_v24 = vmax.f32 %v531_v19, %v532_v22 }
 0x200   : > { %v542_v25 = vrot.slane %v541_v23, 2 }
 0x201   : > { %v535_v26 = vsub.f32 %v518_v13, %v533_v24 }
 0x202   : > { %v543_v27 = vadd.f32 %v542_v25, %v541_v23 }
 0x203   : > { %v538_v29 = vmul.f32 1.442695, %v535_v26 }
 0x204   : > { %v544_v30 = vrot.slane %v543_v27, 1 }
 0x205   : > { %882 = vpow2.f32 %v538_v29 }
 0x206   : > { %v545_v31 = vadd.f32 %v544_v30, %v543_v27 }
 0x208   : > { %884 = vrcp.f32 %v545_v31 }
 0x20b   : > { %v883_v32 = vpop.eup %882 }
 0x20c   : > { %v546_v33 = vrot.slane %v883_v32, 4 }
 0x20e   : > { %v885_v35 = vpop.eup %884  ;;  %v547_v36 = vadd.f32 %v883_v32, %v546_v33 }
 0x20f   : > { %v554_v37 = vmul.f32 %v885_v35, %v881_v18 }
 0x210   : > { %v548_v38 = vrot.slane %v547_v36, 2 }
 0x211   : > { %v556_v39 = vpack.c.bf16 %v554_v37, %v554_v37 }
 0x212   : > { %v549_v40 = vadd.f32 %v548_v38, %v547_v36 }
 0x213   : > { %v567_v41 = vsel %vm565_vm3, %v556_v39, 0 }
 0x214   : > { %579 = vmatpush.bf16.msrb.mxu1 %v567_v41  ;;  %v550_v43 = vrot.slane %v549_v40, 1 }
 0x216   : > { %v551_v44 = vadd.f32 %v550_v43, %v549_v40 }
 0x217   : > { %792 = vmatmul.msk.bf16.vlgmr.msrb.gmra.mxu1 %vm558_vm4, %v384_v42 }
 0x218   : > { %886 = vrcp.f32 %v551_v44 }
 0x21e   : > { %v887_v46 = vpop.eup %886 }
 0x21f   : > { %v555_v47 = vmul.f32 %v887_v46, %v883_v32 }
 0x221   : > { %v557_v49 = vpack.c.bf16 %v555_v47, %v555_v47 }
 0x223   : > { %v570_v50 = vsel %vm565_vm3, %v557_v49, 0 }
 0x224   : > { %598 = vmatpush.bf16.msrb.mxu2 %v570_v50 }
 0x227   : > { %794 = vmatmul.msk.bf16.vlgmr.msrb.gmra.mxu2 %vm558_vm4, %v384_v42  ;;  %793 = vmatmul.msk.bf16.gmra.mxu1 %vm558_vm4, %v385_v51 }
 0x237   : > { %795 = vmatmul.msk.bf16.gmra.mxu2 %vm558_vm4, %v385_v51 }
 0x294   : > { %v581_v52 = vpop.f32.mrf.mxu1 }
 0x295   : > { %v610_v53 = vadd.f32 %v581_v52, %v1132_v7 }
 0x297   : > { %618 = vst [vmem:[%s277_s28] sm:$0xff] %v610_v53 }
 0x29c   : > { %v583_v54 = vpop.f32.mrf.mxu1 }
 0x29d   : > { %v612_v55 = vadd.f32 %v583_v54, %v1134_v8 }
 0x29f   : > { %620 = vst [vmem:[%s277_s28 + $0x10] sm:$0xff] %v612_v55 }
 0x2a4   : > { %v586_v56 = vpop.f32.mrf.mxu1 }
 0x2a5   : > { %v614_v57 = vadd.f32 %v586_v56, %v1126_v3 }
 0x2a7   : > { %622 = vst [vmem:[%s277_s28 + $0x20] sm:$0xff] %v614_v57 }
 0x2aa   : > { %v600_v58 = vpop.f32.mrf.mxu2 }
 0x2ab   : > { %v611_v59 = vadd.f32 %v600_v58, %v1140_v12 }
 0x2ac   : > { %v588_v60 = vpop.f32.mrf.mxu1 }
 0x2ad   : > { %619 = vst [vmem:[%s277_s28 + $0x8] sm:$0xff] %v611_v59  ;;  %v616_v61 = vadd.f32 %v588_v60, %v1128_v4 }
 0x2af   : > { %624 = vst [vmem:[%s277_s28 + $0x30] sm:$0xff] %v616_v61 }
 0x2b2   : > { %v602_v7 = vpop.f32.mrf.mxu2 }
 0x2b3   : > { %v613_v62 = vadd.f32 %v602_v7, %v1146_v15 }
 0x2b5   : > { %621 = vst [vmem:[%s277_s28 + $0x18] sm:$0xff] %v613_v62 }
 0x2ba   : > { %v605_v8 = vpop.f32.mrf.mxu2 }
 0x2bb   : > { %v615_v63 = vadd.f32 %v605_v8, %v1136_v10 }
 0x2bd   : > { %623 = vst [vmem:[%s277_s28 + $0x28] sm:$0xff] %v615_v63 }
 0x2c2   : > { %v607_v3 = vpop.f32.mrf.mxu2 }
 0x2c3   : > { %v617_v4 = vadd.f32 %v607_v3, %v1138_v11 }
 0x2c5   : > { %625 = vst [vmem:[%s277_s28 + $0x38] sm:$0xff] %v617_v4 }
 0x2c6   : > { %945 = shalt.err (!%p942_p0)
}
 0x2c7   : > { %s1005_s29 = smov 256   ;;  %s1006_s28 = smov 16  }
 0x2c8   : > { %813 = dma.vmem_to_hbm [thread:$0]  (%p1088_p9), %s642_s14, 1024, %s644_s15, %s627_s30, %s1005_s29, %s1005_s29, %s1006_s28  }
 0x2c9 PF: > { %s658_s10 = sand.u32 1, %s980_s18   ;;  %p820_p1 = pnand %p746_p12, %p1095_p11 }
 0x2ca   : > { %s659_s9 = scalar_lea.sflag [#allocation4], %s658_s10 }
 0x2cb   : > { %p821_p2 = pneg %p820_p1 }
 0x2cd   : > { %975 = dma.done.wait (%p821_p2), %s659_s9, 1024  }
 0x2ce   : > { %977 = vsyncadd (%p821_p2), %s659_s9, 4294966272  ;;  %s21_s23 = sadd.s32 1, %s1000_s23   ;;  %s1250_s18 = smov %s984_s19 }
 0x2cf   : > { %p18_p3 = scmp.ge.s32.totalorder %s21_s23, 4   ;;  %s1251_s19 = smov %s988_s20 }
 0x2d0   : > { %s1252_s20 = smov %s1093_s7  ;;  %s1253_s21 = smov %s996_s22 }
 0x2d1   : > { %s1254_s22 = smov %s1256_s26  ;;  %20 = sbr.rel (!%p18_p3) target bundleno = 6 (0x6), region = 88 }
 0x2d6   :  { %665 = vsyncpa [#allocation3], 1 }
 0x2d7   :  { %667 = vsyncpa [#allocation3 + $0x1], 1 }
 0x2d8   :  { %668 = vsyncpa [#allocation4], 1 }
 0x2d9   :  { %670 = vsyncpa [#allocation4 + $0x1], 1 }

</bundles_post_ra>
